<compile_context>
chip_gen: v7x
topology: tpu7x:2x2x1
jax: 0.10.0
libtpu: 0.0.40
codegen_flags: <defaults>
</compile_context>

<pallas_src>
import jax
import jax.numpy as jnp
from jax import lax
from jax.experimental import pallas as pl
from jax.experimental.pallas import tpu as pltpu


_LANE = 128


def _round_up(x, m):
    return (x + m - 1) // m * m


def _default_vmem_limit_bytes():
    """Per-generation scoped-VMEM budget.

    v5e/v6e: 128 MiB physical -> ~96 MiB scoped; v7x: 64 MiB physical -> 48 MiB.
    Falls back to the conservative 48 MiB if the query is unavailable.
    """
    try:
        cap = int(pltpu.get_tpu_info().vmem_capacity_bytes)
    except Exception:  # old runtime / CPU interpret fallback
        cap = 64 * 1024 * 1024
    return min(cap * 3 // 4, 100 * 1024 * 1024)


def _plan_tiles(m, h_in_p, h_out_p, x_bpe, w_bpe, out_bpe, vmem_limit_bytes,
                tm, tn, granule):
    """Choose (tm, tn) tile sizes that fit the scoped-VMEM budget."""
    budget = int(vmem_limit_bytes * 0.85)   # headroom for compiler scratch

    # Weight (+ f32 bias) VMEM footprint for a given N tile.  The Pallas
    # pipeline double-buffers every input block (even constant-index ones),
    # hence the 2x.
    # TODO(synk): once pipeline_mode=pl.Buffered(1) is confirmed for
    # constant-index blocks on the deployed jax, single-buffer the weight and
    # drop this 2x.
    def _weight_bytes(tn_):
        return 2 * (h_in_p * tn_ * w_bpe + tn_ * 4)

    if tn is not None:
        tn = min(h_out_p, _round_up(int(tn), _LANE))
    elif _weight_bytes(h_out_p) <= budget // 2:
        tn = h_out_p                       # whole weight stays VMEM-resident
    else:
        # Large square layer on a small-VMEM chip (v7x): tile H_out instead of
        # collapsing tm to a handful of overhead-dominated rows.
        tn = (budget // 2) // (2 * h_in_p * w_bpe)
        tn = max(_LANE, (tn // _LANE) * _LANE)
        tn = min(tn, h_out_p)

    per_row = 2 * (h_in_p * x_bpe + tn * out_bpe)   # double-buffered x / out
    rem = budget - _weight_bytes(tn)
    if rem < per_row * granule:
        raise ValueError(
            "sequence_wise_linear: weight tile does not fit the VMEM budget "
            f"(h_in_p={h_in_p}, tn={tn}, budget={budget} bytes).")

    if tm is None:
        tm = (rem // per_row) // granule * granule
        tm = max(granule, min(1024, tm))
        tm = min(tm, _round_up(m, granule))
        # v7x megacore: guarantee >= 2 M tiles when there is enough work so
        # both TensorCores stream tiles.
        if m > granule and pl.cdiv(m, tm) < 2:
            tm = max(granule, _round_up(pl.cdiv(m, 2), granule))
    else:
        tm = max(granule, _round_up(int(tm), granule))
    return int(tm), int(tn)


def _make_fc_kernel(valid_cols, fuse_softmax):
    def kernel(x_ref, w_ref, b_ref, o_ref):
        # (tm, K) @ (K, tn) on the MXU with f32 accumulation; the weight was
        # transposed once in the wrapper, so no per-step XLU transpose here.
        acc = jnp.dot(x_ref[...], w_ref[...], preferred_element_type=jnp.float32)
        acc = acc + b_ref[...]                       # bias kept in f32
        if fuse_softmax:
            # Inference softmax over the valid H_out columns (padded lanes
            # masked to -inf so they contribute exp() == 0).
            if valid_cols < acc.shape[-1]:
                col = lax.broadcasted_iota(jnp.int32, acc.shape, 1)
                acc = jnp.where(col < valid_cols, acc, -jnp.inf)
            row_max = jnp.max(acc, axis=-1, keepdims=True)
            e = jnp.exp(acc - row_max)
            denom = jnp.sum(e, axis=-1, keepdims=True)
            acc = e * pl.reciprocal(denom, approx=True)
        o_ref[...] = acc.astype(o_ref.dtype)
    return kernel


def sequence_wise_linear(x, weight, bias=None, *, compute_dtype=jnp.bfloat16,
                         fuse_softmax=False, tm=None, tn=None,
                         vmem_limit_bytes=None):
    """SequenceWise(nn.Linear): y = reshape(flatten(x) @ weight.T + bias).

    x:      (T, N, H_in)   time-major (PyTorch T*N*H convention)
    weight: (H_out, H_in)  PyTorch nn.Linear layout
    bias:   (H_out,) or None
    compute_dtype: MXU operand dtype for x / weight.  Defaults to bf16 — an
        explicit, documented numerics choice (halves HBM/VMEM traffic, hits the
        bf16-native MXU on every TPU generation); accumulation is f32 and the
        bias stays f32.  Pass compute_dtype=None to keep x.dtype.
    fuse_softmax: apply softmax over the valid H_out columns in the kernel
        epilogue (DeepSpeech InferenceBatchSoftmax, eval mode).  Requires the
        whole H_out to live in a single tile.
    Returns (T, N, H_out) in x.dtype.
    """
    t, n, h_in = x.shape
    h_out, h_in_w = weight.shape
    assert h_in_w == h_in, "weight must be (H_out, H_in)"
    out_dtype = x.dtype
    if compute_dtype is None:
        compute_dtype = x.dtype
    compute_dtype = jnp.dtype(compute_dtype)

    m = t * n
    h_in_p = _round_up(h_in, _LANE)
    h_out_p = _round_up(h_out, _LANE)
    x_bpe = compute_dtype.itemsize
    out_bpe = jnp.dtype(out_dtype).itemsize
    granule = 16 if x_bpe < 4 else 8          # bf16 packs 2 rows per sublane

    if vmem_limit_bytes is None:
        vmem_limit_bytes = _default_vmem_limit_bytes()

    tm, tn = _plan_tiles(m, h_in_p, h_out_p, x_bpe, x_bpe, out_bpe,
                         vmem_limit_bytes, tm, tn, granule)
    num_m = pl.cdiv(m, tm)
    num_n = pl.cdiv(h_out_p, tn)
    if fuse_softmax and num_n != 1:
        raise ValueError("fuse_softmax requires the whole H_out in one tile")

    # ---- wrapper glue (no full-array copies on the aligned fast path) -------
    x_flat = x.reshape(m, h_in)
    if x_flat.dtype != compute_dtype:
        # Documented cast; in a fused production pipeline the upstream producer
        # already emits compute_dtype and this copy disappears.
        x_flat = x_flat.astype(compute_dtype)
    if h_in == h_in_p:
        # Fast path: no padding copy of x; the ragged last M block is handled by
        # the cdiv grid (OOB reads unspecified, OOB writes dropped, rows are
        # independent so no valid row is affected).
        x_p = x_flat
    else:
        # K padding must be real zeros: it enters the contraction.
        x_p = jnp.pad(x_flat, ((0, 0), (0, h_in_p - h_in)))

    # One-time transpose+pad of the (small) weight into the canonical (K, N)
    # MXU layout; explicit downcast to compute_dtype.
    w_p = jnp.pad(weight.T.astype(compute_dtype),
                  ((0, h_in_p - h_in), (0, h_out_p - h_out)))
    if bias is None:
        b_p = jnp.zeros((1, h_out_p), jnp.float32)
    else:
        b_p = jnp.pad(bias.astype(jnp.float32).reshape(1, h_out),
                      ((0, 0), (0, h_out_p - h_out)))

    kernel = _make_fc_kernel(h_out, fuse_softmax)

    out_p = pl.pallas_call(
        kernel,
        out_shape=jax.ShapeDtypeStruct((m, h_out_p), out_dtype),
        grid_spec=pltpu.PrefetchScalarGridSpec(
            num_scalar_prefetch=0,
            grid=(num_m, num_n),
            in_specs=[
                pl.BlockSpec((tm, h_in_p), lambda i, j: (i, 0)),   # streamed x
                pl.BlockSpec((h_in_p, tn), lambda i, j: (0, j)),   # weight tile
                pl.BlockSpec((1, tn), lambda i, j: (0, j)),        # f32 bias
            ],
            out_specs=pl.BlockSpec((tm, tn), lambda i, j: (i, j)),
        ),
        compiler_params=pltpu.CompilerParams(
            dimension_semantics=("parallel", "arbitrary"),
            vmem_limit_bytes=int(vmem_limit_bytes),
        ),
        cost_estimate=pl.CostEstimate(
            flops=2 * m * h_in_p * h_out_p,
            bytes_accessed=int(m * h_in_p * x_bpe + h_in_p * h_out_p * x_bpe
                               + m * h_out_p * out_bpe),
            transcendentals=int(m * h_out_p) if fuse_softmax else 0,
        ),
    )(x_p, w_p, b_p)

    # No M slice ever (output rows == m); skip the column slice when H_out is
    # already lane-aligned (inner layers).
    out = out_p if h_out == h_out_p else out_p[:, :h_out]
    return out.reshape(t, n, h_out)


def deepspeech_fc_head(x, bn_gamma, bn_beta, bn_mean, bn_var, linear_weight, *,
                       eps=1e-5, apply_softmax=True,
                       compute_dtype=jnp.bfloat16, **kwargs):
    """Tail of DeepSpeech.forward as one fused Pallas kernel call.

    Implements SequenceWise(Sequential(BatchNorm1d(H), Linear(H, C, bias=False)))
    -> transpose(0, 1) -> InferenceBatchSoftmax (both set to eval mode in the
    reference forward).  The eval-mode BatchNorm1d is an exact per-feature
    affine and is folded into the Linear weight/bias in the wrapper (tiny
    (C, H) math), so the kernel sees a single matmul with a softmax epilogue.

    x: (T, N, H) RNN-stack output.  Returns (N, T, C).
    """
    inv_std = lax.rsqrt(bn_var.astype(jnp.float32) + eps)
    scale = bn_gamma.astype(jnp.float32) * inv_std               # (H,)
    shift = bn_beta.astype(jnp.float32) - bn_mean.astype(jnp.float32) * scale
    w_f32 = linear_weight.astype(jnp.float32)                    # (C, H)
    w_eff = w_f32 * scale[None, :]
    b_eff = w_f32 @ shift                                        # (C,)
    y = sequence_wise_linear(x, w_eff, b_eff, compute_dtype=compute_dtype,
                             fuse_softmax=apply_softmax, **kwargs)  # (T, N, C)
    # Softmax over the last axis commutes with the (0, 1) transpose.
    return jnp.transpose(y, (1, 0, 2))                            # (N, T, C)


# TODO(synk): the conv stack (MaskConv/Conv2d/BatchNorm2d/Hardtanh), the
# bidirectional LSTM BatchRNN stack (pack_padded_sequence) and the Lookahead
# conv are not implemented as Pallas kernels here; only the SequenceWise FC +
# inference-softmax head (the dense hot path) is.

if __name__ == "__main__":
    key = jax.random.PRNGKey(0)
    T, N = 12, 3
    ks = jax.random.split(key, 8)

    # --- 1) Unaligned H_in (zero-pad K fallback), f32 compute: exact check ---
    H_IN, H_OUT = 160, 29
    x = jax.random.normal(ks[0], (T, N, H_IN), dtype=jnp.float32)
    w = jax.random.normal(ks[1], (H_OUT, H_IN), dtype=jnp.float32) * 0.05
    b = jax.random.normal(ks[2], (H_OUT,), dtype=jnp.float32) * 0.05
    out = jax.block_until_ready(
        sequence_wise_linear(x, w, b, compute_dtype=jnp.float32))
    ref = (x.reshape(T * N, H_IN) @ w.T + b).reshape(T, N, H_OUT)
    assert out.shape == (T, N, H_OUT)
    assert jnp.allclose(out, ref, atol=1e-5, rtol=1e-5)

    # --- 2) Lane-aligned H_in (no-pad fast path), bf16 compute, ragged grid --
    H_IN2 = 256
    x2 = jax.random.normal(ks[3], (T, N, H_IN2), dtype=jnp.float32)
    w2 = jax.random.normal(ks[4], (H_OUT, H_IN2), dtype=jnp.float32) * 0.05
    out2 = jax.block_until_ready(
        sequence_wise_linear(x2, w2, None, compute_dtype=jnp.bfloat16, tm=16))
    ref2 = (x2.reshape(T * N, H_IN2) @ w2.T).reshape(T, N, H_OUT)
    assert jnp.allclose(out2, ref2, atol=3e-2, rtol=3e-2)

    # --- 3) N-tiled weight path (v7x big-layer fallback), f32 exact check ----
    H_IN3, H_OUT3 = 128, 256
    x3 = jax.random.normal(ks[5], (T, N, H_IN3), dtype=jnp.float32)
    w3 = jax.random.normal(ks[6], (H_OUT3, H_IN3), dtype=jnp.float32) * 0.05
    out3 = jax.block_until_ready(
        sequence_wise_linear(x3, w3, None, compute_dtype=jnp.float32, tn=128))
    ref3 = (x3.reshape(T * N, H_IN3) @ w3.T).reshape(T, N, H_OUT3)
    assert jnp.allclose(out3, ref3, atol=1e-5, rtol=1e-5)

    # --- 4) Full DeepSpeech fc head: BN fold + Linear + fused softmax --------
    H4, C = 256, 29
    x4 = jax.random.normal(ks[7], (T, N, H4), dtype=jnp.float32)
    kg, kb_, km, kv, kw4 = jax.random.split(jax.random.PRNGKey(1), 5)
    gamma = 1.0 + 0.1 * jax.random.normal(kg, (H4,), jnp.float32)
    beta = 0.1 * jax.random.normal(kb_, (H4,), jnp.float32)
    mean = 0.1 * jax.random.normal(km, (H4,), jnp.float32)
    var = jnp.abs(1.0 + 0.1 * jax.random.normal(kv, (H4,), jnp.float32))
    w4 = jax.random.normal(kw4, (C, H4), jnp.float32) * 0.05
    out4 = jax.block_until_ready(
        deepspeech_fc_head(x4, gamma, beta, mean, var, w4))
    xn = (x4 - mean) * lax.rsqrt(var + 1e-5) * gamma + beta
    logits = (xn.reshape(T * N, H4) @ w4.T).reshape(T, N, C)
    ref4 = jnp.transpose(jax.nn.softmax(logits, axis=-1), (1, 0, 2))
    assert out4.shape == (N, T, C)
    assert jnp.allclose(out4, ref4, atol=1e-2, rtol=0)

    print("KERNEL_OK")
</pallas_src>

<mosaic_0001>
module attributes {stable_mosaic.version = 11 : i64} {
  func.func @kernel(%arg0: i32, %arg1: i32, %arg2: memref<24x256xf32, #tpu.memory_space<vmem>>, %arg3: memref<256x128xf32, #tpu.memory_space<vmem>>, %arg4: memref<1x128xf32, #tpu.memory_space<vmem>>, %arg5: memref<24x128xf32, #tpu.memory_space<vmem>>) attributes {dimension_semantics = [#tpu.dimension_semantics<parallel>, #tpu.dimension_semantics<arbitrary>], iteration_bounds = array<i64: 2, 1>, scalar_prefetch = 0 : i64, scratch_operands = 0 : i64, tpu.core_type = #tpu.core_type<tc>, window_params = [{transform_indices = @transform_0, window_bounds = array<i64: 24, 256>}, {transform_indices = @transform_1, window_bounds = array<i64: 256, 128>}, {transform_indices = @transform_2, window_bounds = array<i64: 1, 128>}, {transform_indices = @transform_3, window_bounds = array<i64: 24, 128>}]} {
    %c0 = arith.constant 0 : index
    %c0_0 = arith.constant 0 : index
    %0 = vector.load %arg2[%c0, %c0_0] : memref<24x256xf32, #tpu.memory_space<vmem>>, vector<24x256xf32>
    %c0_1 = arith.constant 0 : index
    %c0_2 = arith.constant 0 : index
    %1 = vector.load %arg3[%c0_1, %c0_2] : memref<256x128xf32, #tpu.memory_space<vmem>>, vector<256x128xf32>
    %cst = arith.constant dense<0.000000e+00> : vector<24x128xf32>
    %2 = tpu.matmul %0, %1, %cst {dimension_numbers = #tpu.dot_dimension_numbers<[1], [0], [0], [1], [0, 0, 1, 1], [], []>} : vector<24x256xf32>, vector<256x128xf32>, vector<24x128xf32> -> vector<24x128xf32>
    %c0_3 = arith.constant 0 : index
    %c0_4 = arith.constant 0 : index
    %3 = vector.load %arg4[%c0_3, %c0_4] : memref<1x128xf32, #tpu.memory_space<vmem>>, vector<1x128xf32>
    %4 = vector.broadcast %3 : vector<1x128xf32> to vector<24x128xf32>
    %5 = arith.addf %2, %4 : vector<24x128xf32>
    %c0_5 = arith.constant 0 : index
    %c0_6 = arith.constant 0 : index
    %6 = vector.load %arg5[%c0_5, %c0_6] : memref<24x128xf32, #tpu.memory_space<vmem>>, vector<24x128xf32>
    tpu.vector_store %arg5[%c0_5, %c0_6], %5 {strides = array<i32>} : memref<24x128xf32, #tpu.memory_space<vmem>>, vector<24x128xf32>,
    return
  }
  func.func @transform_0(%arg0: i32, %arg1: i32) -> (i32, i32) {
    %c0_i32 = arith.constant 0 : i32
    %c0_i32_0 = arith.constant 0 : i32
    return %arg0, %c0_i32 : i32, i32
  }
  func.func @transform_1(%arg0: i32, %arg1: i32) -> (i32, i32) {
    %c0_i32 = arith.constant 0 : i32
    %c0_i32_0 = arith.constant 0 : i32
    return %c0_i32, %arg1 : i32, i32
  }
  func.func @transform_2(%arg0: i32, %arg1: i32) -> (i32, i32) {
    %c0_i32 = arith.constant 0 : i32
    %c0_i32_0 = arith.constant 0 : i32
    return %c0_i32, %arg1 : i32, i32
  }
  func.func @transform_3(%arg0: i32, %arg1: i32) -> (i32, i32) {
    %c0_i32 = arith.constant 0 : i32
    return %arg0, %arg1 : i32, i32
  }
}

</mosaic_0001>

<bundles_post_ra>
// kernel: tpu_custom_call.1
= control target key start
LH: loop header
LB: loop body
LE: loop exit
PB: predicated region body
PF: predicated region fallthrough
CT: control target
= control target key end

     0   :  { %8 = vsyncpa [#allocation3], 0  ;;  %s1118_s0 = inlined_call_operand.hbm [shape: f32[36,256], index: 0, kind: input, shape index: {}]   ;;  %s1119_s1 = inlined_call_operand.hbm [shape: f32[256,128], index: 1, kind: input, shape index: {}]   ;;  %s1120_s2 = inlined_call_operand.vmem [shape: f32[1,128], index: 2, kind: input, shape index: {}]   ;;  %s1121_s3 = inlined_call_operand.hbm [shape: f32[36,128], index: 3, kind: output, shape index: {}]  }
   0x1   :  { %10 = vsyncpa [#allocation3 + $0x1], 0 }
   0x2   :  { %11 = vsyncpa [#allocation6], 0 }
   0x3   :  { %12 = vsyncpa [#allocation4], 0 }
   0x4   :  { %14 = vsyncpa [#allocation4 + $0x1], 0  ;;  %s879_s12 = smov 0   ;;  %s881_s13 = smov 0  }
   0x5   :  { %s883_s14 = smov 0   ;;  %s885_s15 = smov 0  }
   0x6   :  { %s887_s16 = smov 0   ;;  %s889_s17 = smov 0  }
   0x7 LB: > { %s514_s18 = sadd.s32 4294967295, %s848_s17   ;;  %s515_s19 = sadd.s32 4294967294, %s848_s17   ;;  %s848_s17 = sphi %s889_s17, %s20_s17   ;;  %s844_s16 = sphi %s887_s16, %s1143_s16   ;;  %s840_s15 = sphi %s885_s15, %s1142_s15   ;;  %s836_s14 = sphi %s883_s14, %s1141_s14   ;;  %s832_s13 = sphi %s881_s13, %s1140_s13   ;;  %s828_s12 = sphi %s879_s12, %s1139_s12  }
   0x8   : > { %s32_s20 = sadd.s32 1, %s844_s16  ;;  %s39_s21 = sadd.s32 1, %s836_s14 }
   0x9   : > { %p34_p0 = scmp.ge.s32.totalorder %s32_s20, 2  ;;  %p46_p1 = scmp.ne.s32.totalorder %s836_s14, %s832_s13 }
   0xa   : > { %p47_p2 = scmp.eq.s32.totalorder %s848_s17, 0  ;;  %p52_p3 = scmp.ne.s32.totalorder %s832_s13, %s828_s12 }
   0xb   : > { %s1145_s20 = smov (%p34_p0, %s32_s20), 0  ;;  %p924_p5 = scmp.eq.s32.totalorder %s514_s18, 0 }
   0xc   : > { %p920_p4 = por %p47_p2, %p46_p1  ;;  %s36_s24 = ssub.s32 %s844_s16, %s1145_s20 }
   0xd   : > { %s1127_s23 = scalar_select %p924_p5, 1, 0 }
   0xe   : > { %s1126_s22 = scalar_select %p920_p4, 1, 0 }
   0xf   : > { %p130_p6 = scmp.eq.s32.totalorder %s514_s18, 1  ;;  %p37_p7 = scmp.eq.s32.totalorder %s36_s24, 0 }
  0x10   : > { %p932_p8 = por %p924_p5, %p52_p3  ;;  %p136_p10 = scmp.eq.s32.totalorder %s515_s19, 1 }
  0x11   : > { %p936_p9 = por %p130_p6, %p46_p1  ;;  %p516_p12 = scmp.ge.s32.totalorder %s848_s17, 1 }
  0x12   : > { %s1128_s25 = scalar_select %p932_p8, 1, 0 }
  0x13   : > { %s1129_s26 = scalar_select %p936_p9, 1, 0 }
  0x14   : > { %s941_s27 = scalar_select %p37_p7, %s836_s14, %s39_s21  }
  0x15   : > { %p943_p11 = por %p136_p10, %p52_p3  ;;  %p143_p13 = scmp.lt.s32.totalorder %s848_s17, 3 }
  0x16   : > { %s850_s30 = smov [#allocation5]   ;;  %s706_s8 = scalar_lea.hbm %s1119_s1, 4096 }
  0x17   : > { %s1130_s28 = scalar_select %p943_p11, 1, 0 }
  0x18   : > { %p949_p0 = pnand %p516_p12, %p143_p13  ;;  %s157_s4 = sshll.u32 %s850_s30, 4  ;;  %s158_s4 = int_to_ptr.vmem [resolvable:$true] %s157_s4 }
  0x19   : > { %p707_p3 = scmp.ne.s32.totalorder %s1119_s1, %s706_s8  ;;  %p713_p12 = scmp.lt.u32.totalorder %s706_s8, %s1119_s1 }
  0x1a   : > { %s1131_s29 = scalar_select %p949_p0, 1, 0 }
  0x1b   : > { %p640_p1 = pneg %p949_p0 }
  0x1d   : > { %p957_p2 = pnand %p640_p1, %p924_p5 }
  0x1f   : > { %p708_p6 = pneg %p957_p2 }
  0x21   : > { %p709_p7 = pnand %p708_p6, %p707_p3 }
  0x23   : > { %p710_p10 = pneg %p709_p7 }
  0x25   : > { %p715_p13 = pnand %p713_p12, %p710_p10 }
  0x27   : > { %718 = shalt.err (!%p715_p13)
}
  0x28   : > { %s719_s19 = scalar_lea.vmem %s158_s4, 4096  ;;  %p727_p5 = scmp.lt.s32.totalorder %s158_s4, %s158_s4 }
  0x29   : > { %p720_p1 = scmp.ne.s32.totalorder %s158_s4, %s719_s19  ;;  %p728_p8 = scmp.lt.s32.totalorder %s719_s19, %s719_s19 }
  0x2b   : > { %p722_p11 = pnand %p720_p1, %p708_p6  ;;  %p729_p0 = por %p728_p8, %p727_p5 }
  0x2d   : > { %p723_p9 = pneg %p722_p11 }
  0x2f   : > { %p730_p4 = pnand %p729_p0, %p723_p9 }
  0x31   : > { %733 = shalt.err (!%p730_p4)
}
  0x32   : > { %s851_s21 = smov 128   ;;  %s852_s24 = smov 8  }
  0x33   : > { %643 = dma.hbm_to_vmem [thread:$0]  (!%p957_p2), %s1119_s1, 4096, %s158_s4, [#allocation6], %s851_s21, %s851_s21, %s852_s24  }
  0x34   : > { %p519_p3 = scmp.ge.s32.totalorder %s848_s17, 2 }
  0x35   : > { %p1133_p11 = scmp.ne.s32.totalorder (!%p519_p3), %s1126_s22, 0 }
  0x36   : > { %173 = sbr.rel (%p519_p3) target bundleno = 96 (0x60), region = 24 }
  0x3d   : > { %176 = sbr.rel (!%p1133_p11) target bundleno = 96 (0x60), region = 28  ;;  %s177_s7 = sand.u32 (%p1133_p11), 1, %s836_s14  }
  0x3e   : > { %s182_s8 = smul.u32 (%p1133_p11), 3, %s844_s16  ;;  %s987_s11 = scalar_lea.sflag (%p1133_p11), [#allocation3], %s177_s7 }
  0x3f   : > { %s631_s9 = smul.u32 (%p1133_p11), 48, %s177_s7 }
  0x40   : > { %s183_s10 = ssub.s32 (%p1133_p11), 5, %s182_s8 }
  0x41   : > { %p184_p4 = scmp.lt.s32.totalorder (%p1133_p11), %s183_s10, 3  ;;  %s181_s18 = scalar_lea.vmem (%p1133_p11), [#allocation2], %s631_s9 }
  0x44   : > { %s1147_s10 = smov (!%p184_p4, %s183_s10), 3 }
  0x45   : > { %s984_s5 = sshll.u32 %s1147_s10, 8 }
  0x46   : > { %s189_s4 = ssub.s32 768, %s984_s5 }
  0x47   : > { %190 = vsyncadd %s987_s11, %s189_s4  ;;  %p522_p5 = scmp.ne.s32.totalorder %s984_s5, 0  ;;  %s541_s22 = smul.u32 768, %s844_s16 }
  0x48   : > { %s196_s19 = sshll.u32 %s181_s18, 4  ;;  %s738_s9 = scalar_lea.hbm %s1118_s0, 1280  ;;  %s997_s19 = int_to_ptr.vmem [resolvable:$true] %s196_s19 }
  0x49   : > { %s995_s30 = scalar_lea.hbm %s1118_s0, %s541_s22 }
  0x4a   : > { %s734_s6 = scalar_lea.hbm %s995_s30, %s984_s5  ;;  %p739_p2 = scmp.lt.u32.totalorder %s995_s30, %s1118_s0 }
  0x4b   : > { %p735_p8 = scmp.ne.s32.totalorder %s995_s30, %s734_s6  ;;  %p740_p6 = scmp.lt.u32.totalorder %s738_s9, %s734_s6 }
  0x4c   : > { %p742_p10 = scmp.lt.u32.totalorder %s734_s6, %s995_s30 }
  0x4d   : > { %p736_p9 = pnand %p735_p8, %p522_p5  ;;  %p741_p7 = por %p740_p6, %p739_p2 }
  0x4f   : > { %p737_p0 = pneg %p736_p9  ;;  %p743_p12 = por %p742_p10, %p741_p7 }
  0x51   : > { %p744_p13 = pnand %p743_p12, %p737_p0 }
  0x53   : > { %747 = shalt.err (!%p744_p13)
}
  0x54   : > { %s748_s18 = scalar_lea.vmem %s997_s19, %s984_s5  ;;  %s853_s22 = smov [#allocation2]  }
  0x55   : > { %p749_p1 = scmp.ne.s32.totalorder %s997_s19, %s748_s18  ;;  %s752_s21 = sshll.u32 %s853_s22, 4  ;;  %s753_s21 = int_to_ptr.vmem [resolvable:$false] %s752_s21 }
  0x56   : > { %s754_s24 = scalar_lea.vmem %s753_s21, 1536  ;;  %p755_p8 = scmp.lt.s32.totalorder %s997_s19, %s753_s21 }
  0x57   : > { %p750_p11 = pnand %p749_p1, %p522_p5  ;;  %p756_p9 = scmp.lt.s32.totalorder %s754_s24, %s748_s18 }
  0x59   : > { %p751_p4 = pneg %p750_p11  ;;  %p757_p2 = por %p756_p9, %p755_p8 }
  0x5b   : > { %p758_p6 = pnand %p757_p2, %p751_p4 }
  0x5d   : > { %761 = shalt.err (!%p758_p6)
}
  0x5e   : > { %s854_s6 = smov 256   ;;  %s855_s7 = smov 16  }
  0x5f   : > { %202 = dma.hbm_to_vmem [thread:$0]  (%p522_p5), %s995_s30, %s984_s5, %s997_s19, %s987_s11, %s854_s6, %s854_s6, %s855_s7  }
  0x60 PF: > { %p1134_p0 = scmp.ne.s32.totalorder %s1131_s29, 0 }
  0x61   : > { %s1027_s8 = sand.u32 (!%p1134_p0), 1, %s832_s13   ;;  %p1135_p7 = scmp.ne.s32.totalorder (!%p1134_p0), %s1128_s25, 0 }
  0x62   : > { %208 = sbr.rel (%p1134_p0) target bundleno = 394 (0x18a), region = 32  ;;  %s211_s10 = scalar_lea.sflag (!%p1134_p0), [#allocation3], %s1027_s8 }
  0x63   : > { %s632_s9 = smul.u32 (!%p1134_p0), 48, %s1027_s8 }
  0x65   : > { %s1031_s4 = scalar_lea.vmem (!%p1134_p0), [#allocation2], %s632_s9 }
  0x69   : > { %815 = dma.done.wait (%p1135_p7), %s211_s10, 768  }
  0x6a   : > { %817 = vsyncadd (%p1135_p7), %s211_s10, 4294966528  ;;  %p1136_p5 = scmp.ne.s32.totalorder %s1127_s23, 0 }
  0x6c   : > { %819 = dma.done.wait (%p1136_p5), [#allocation6], 4096  }
  0x6d   : > { %821 = vsyncadd (%p1136_p5), [#allocation6], 4294963200  ;;  %v280_v0 = vld [vmem:[#allocation5 + $0x80] sm:$0xff]  ;;  %v281_v1 = vld [vmem:[#allocation5 + $0x88] sm:$0xff]  ;;  %s633_s23 = smul.u32 24, %s1027_s8  ;;  %s387_s11 = scalar_lea.sflag [#allocation4], %s1027_s8 }
  0x6e   : > { %v264_v2 = vld [vmem:[#allocation5] sm:$0xff]  ;;  %v583_v3 = vpack.c.bf16 %v281_v1, %v280_v0  ;;  %v265_v4 = vld [vmem:[#allocation5 + $0x8] sm:$0xff]  ;;  %v282_v5 = vld [vmem:[#allocation5 + $0x90] sm:$0xff]  ;;  %p1137_p10 = scmp.ne.s32.totalorder %s1129_s26, 0 }
  0x6f   : > { %v283_v6 = vld [vmem:[#allocation5 + $0x98] sm:$0xff]  ;;  %v585_v7 = vpack.c.bf16 %v265_v4, %v264_v2  ;;  %v266_v9 = vld [vmem:[#allocation5 + $0x10] sm:$0xff]  ;;  %v284_v11 = vld [vmem:[#allocation5 + $0xa0] sm:$0xff]  ;;  %s243_s5 = scalar_lea.vmem [#allocation7], %s633_s23  ;;  %s394_s19 = smul.u32 (%p1137_p10), 3, %s840_s15 }
  0x70   : > { %v587_v8 = vpack.c.bf16 %v283_v6, %v282_v5  ;;  %v267_v10 = vld [vmem:[#allocation5 + $0x18] sm:$0xff]  ;;  %615 = vmatprep.subr.bf16.mxu1 %v583_v3  ;;  %584 = vmatprep.subr.bf16.mxu0 %v583_v3  ;;  %v285_v12 = vld [vmem:[#allocation5 + $0xa8] sm:$0xff]  ;;  %v268_v15 = vld [vmem:[#allocation5 + $0x20] sm:$0xff] }
  0x71   : > { %623 = vmatpush3.bf16.msra.mxu1 %v585_v7  ;;  %586 = vmatpush3.bf16.msra.mxu0 %v585_v7  ;;  %v589_v13 = vpack.c.bf16 %v267_v10, %v266_v9  ;;  %v591_v14 = vpack.c.bf16 %v285_v12, %v284_v11  ;;  %v269_v16 = vld [vmem:[#allocation5 + $0x28] sm:$0xff]  ;;  %v286_v17 = vld [vmem:[#allocation5 + $0xb0] sm:$0xff]  ;;  %v287_v18 = vld [vmem:[#allocation5 + $0xb8] sm:$0xff]  ;;  %s395_s30 = ssub.s32 (%p1137_p10), 5, %s394_s19 }
  0x72   : > { %616 = vmatprep.subr.bf16.mxu1 %v587_v8  ;;  %588 = vmatprep.subr.bf16.mxu0 %v587_v8  ;;  %v593_v19 = vpack.c.bf16 %v269_v16, %v268_v15  ;;  %v595_v20 = vpack.c.bf16 %v287_v18, %v286_v17  ;;  %v270_v21 = vld [vmem:[#allocation5 + $0x30] sm:$0xff]  ;;  %v271_v22 = vld [vmem:[#allocation5 + $0x38] sm:$0xff]  ;;  %v288_v23 = vld [vmem:[#allocation5 + $0xc0] sm:$0xff]  ;;  %p396_p12 = scmp.lt.s32.totalorder (%p1137_p10), %s395_s30, 3 }
  0x73   : > { %v289_v24 = vld [vmem:[#allocation5 + $0xc8] sm:$0xff]  ;;  %v597_v27 = vpack.c.bf16 %v271_v22, %v270_v21  ;;  %v272_v29 = vld [vmem:[#allocation5 + $0x40] sm:$0xff]  ;;  %v290_v31 = vld [vmem:[#allocation5 + $0xd0] sm:$0xff] }
  0x74   : > { %v261_v25 = vld [vmem:[%s1031_s4 + $0x18] sm:$0xff]  ;;  %v259_v26 = vld [vmem:[%s1031_s4 + $0x8] sm:$0xff]  ;;  %v599_v28 = vpack.c.bf16 %v289_v24, %v288_v23  ;;  %v274_v35 = vld [vmem:[#allocation5 + $0x50] sm:$0xff] }
  0x75   : > { %624 = vmatpush3.bf16.msra.mxu1 %v589_v13  ;;  %590 = vmatpush3.bf16.msra.mxu0 %v589_v13  ;;  %v273_v30 = vld [vmem:[#allocation5 + $0x48] sm:$0xff]  ;;  %v291_v32 = vld [vmem:[#allocation5 + $0xd8] sm:$0xff]  ;;  %v292_v37 = vld [vmem:[#allocation5 + $0xe0] sm:$0xff] }
  0x76   : > { %617 = vmatprep.subr.bf16.mxu1 %v591_v14  ;;  %592 = vmatprep.subr.bf16.mxu0 %v591_v14  ;;  %v601_v33 = vpack.c.bf16 %v273_v30, %v272_v29  ;;  %v603_v34 = vpack.c.bf16 %v291_v32, %v290_v31  ;;  %v275_v36 = vld [vmem:[#allocation5 + $0x58] sm:$0xff]  ;;  %v293_v38 = vld [vmem:[#allocation5 + $0xe8] sm:$0xff]  ;;  %v276_v41 = vld [vmem:[#allocation5 + $0x60] sm:$0xff] }
  0x77   : > { %372 = vmatprep.mubr.f32.mxu1 %v261_v25  ;;  %367 = vmatprep.mubr.f32.mxu0 %v259_v26  ;;  %v605_v39 = vpack.c.bf16 %v275_v36, %v274_v35  ;;  %v607_v40 = vpack.c.bf16 %v293_v38, %v292_v37  ;;  %v277_v42 = vld [vmem:[#allocation5 + $0x68] sm:$0xff]  ;;  %v294_v43 = vld [vmem:[#allocation5 + $0xf0] sm:$0xff]  ;;  %v295_v44 = vld [vmem:[#allocation5 + $0xf8] sm:$0xff] }
  0x78   : > { %v609_v45 = vpack.c.bf16 %v277_v42, %v276_v41  ;;  %v611_v46 = vpack.c.bf16 %v295_v44, %v294_v43  ;;  %v278_v47 = vld [vmem:[#allocation5 + $0x70] sm:$0xff]  ;;  %v279_v48 = vld [vmem:[#allocation5 + $0x78] sm:$0xff]  ;;  %v529_v56 = vld [vmem:[%s1120_s2] ss:$0 sm:$0xff] }
  0x79   : > { %625 = vmatpush3.bf16.msra.mxu1 %v593_v19  ;;  %594 = vmatpush3.bf16.msra.mxu0 %v593_v19  ;;  %v613_v49 = vpack.c.bf16 %v279_v48, %v278_v47  ;;  %v260_v50 = vld [vmem:[%s1031_s4 + $0x10] sm:$0xff]  ;;  %v258_v51 = vld [vmem:[%s1031_s4] sm:$0xff]  ;;  %v263_v52 = vld [vmem:[%s1031_s4 + $0x28] sm:$0xff] }
  0x7a   : > { %618 = vmatprep.subr.bf16.mxu1 %v595_v20  ;;  %596 = vmatprep.subr.bf16.mxu0 %v595_v20  ;;  %v262_v53 = vld [vmem:[%s1031_s4 + $0x20] sm:$0xff] }
  0x7d   : > { %626 = vmatpush3.bf16.msra.mxu1 %v597_v27  ;;  %598 = vmatpush3.bf16.msra.mxu0 %v597_v27 }
  0x7e   : > { %619 = vmatprep.subr.bf16.mxu1 %v599_v28  ;;  %600 = vmatprep.subr.bf16.mxu0 %v599_v28 }
  0x81   : > { %627 = vmatpush3.bf16.msra.mxu1 %v601_v33  ;;  %602 = vmatpush3.bf16.msra.mxu0 %v601_v33 }
  0x82   : > { %620 = vmatprep.subr.bf16.mxu1 %v603_v34  ;;  %604 = vmatprep.subr.bf16.mxu0 %v603_v34 }
  0x85   : > { %628 = vmatpush3.bf16.msra.mxu1 %v605_v39  ;;  %606 = vmatpush3.bf16.msra.mxu0 %v605_v39 }
  0x86   : > { %621 = vmatprep.subr.bf16.mxu1 %v607_v40  ;;  %608 = vmatprep.subr.bf16.mxu0 %v607_v40 }
  0x89   : > { %629 = vmatpush3.bf16.msra.mxu1 %v609_v45  ;;  %610 = vmatpush3.bf16.msra.mxu0 %v609_v45 }
  0x8a   : > { %622 = vmatprep.subr.bf16.mxu1 %v611_v46  ;;  %612 = vmatprep.subr.bf16.mxu0 %v611_v46 }
  0x8d   : > { %630 = vmatpush3.bf16.msra.mxu1 %v613_v49  ;;  %614 = vmatpush3.bf16.msra.mxu0 %v613_v49 }
  0x90   : > { %373 = vmatmul.mubr.f32.vlgmr.msra.gmra.mrb[0].mxu1 %v260_v50  ;;  %368 = vmatmul.mubr.f32.vlgmr.msra.gmra.mrb[0].mxu0 %v258_v51 }
  0x91   : > { %377 = vmatprep.mubr.f32.mxu1 %v263_v52 }
  0x94   : > { %378 = vmatmul.mubr.f32.gmra.mrb[2].mxu1 %v262_v53 }
 0x163   : > { %v577_v54 = vpop.f32.mrb[0].mxu1  ;;  %v574_v55 = vpop.f32.mrb[0].mxu0 }
 0x164   : > { %v578_v57 = vpop.f32.mrb[1].mxu1  ;;  %v575_v58 = vpop.f32.mrb[1].mxu0 }
 0x165   : > { %v579_v59 = vadd.f32 %v578_v57, %v577_v54  ;;  %v576_v60 = vadd.f32 %v575_v58, %v574_v55 }
 0x167   : > { %v375_v61 = vadd.f32 %v579_v59, %v529_v56  ;;  %v370_v62 = vadd.f32 %v576_v60, %v529_v56  ;;  %v580_v63 = vpop.f32.mrb[2].mxu1  ;;  %393 = sbr.rel (!%p1137_p10) target bundleno = 394 (0x18a), region = 44 }
 0x168   : > { %v581_v0 = vpop.f32.mrb[3].mxu1 }
 0x169   : > { %384 = vst [vmem:[%s243_s5 + $0x8] sm:$0xff] %v375_v61  ;;  %383 = vst [vmem:[%s243_s5] sm:$0xff] %v370_v62  ;;  %v582_v1 = vadd.f32 %v581_v0, %v580_v63 }
 0x16b   : > { %v380_v2 = vadd.f32 %v582_v1, %v529_v56 }
 0x16d   : > { %385 = vst [vmem:[%s243_s5 + $0x10] sm:$0xff] %v380_v2 }
 0x16e   : > { %s1149_s30 = smov (!%p396_p12, %s395_s30), 3 }
 0x16f   : > { %s1055_s18 = sshll.u32 %s1149_s30, 7 }
 0x170   : > { %s400_s22 = ssub.s32 384, %s1055_s18 }
 0x171   : > { %401 = vsyncadd %s387_s11, %s400_s22  ;;  %p531_p13 = scmp.ne.s32.totalorder %s1055_s18, 0  ;;  %s540_s21 = smul.u32 384, %s840_s15 }
 0x172   : > { %s407_s26 = sshll.u32 %s243_s5, 4  ;;  %s856_s10 = smov [#allocation7]   ;;  %s1067_s26 = int_to_ptr.vmem [resolvable:$true] %s407_s26 }
 0x173   : > { %s1065_s7 = scalar_lea.hbm %s1121_s3, %s540_s21  ;;  %s762_s9 = scalar_lea.vmem %s1067_s26, %s1055_s18 }
 0x174   : > { %p763_p1 = scmp.ne.s32.totalorder %s1067_s26, %s762_s9  ;;  %s766_s4 = sshll.u32 %s856_s10, 4  ;;  %s767_s4 = int_to_ptr.vmem [resolvable:$false] %s766_s4 }
 0x175   : > { %s768_s15 = scalar_lea.vmem %s767_s4, 768  ;;  %p769_p8 = scmp.lt.s32.totalorder %s1067_s26, %s767_s4 }
 0x176   : > { %p764_p11 = pnand %p763_p1, %p531_p13  ;;  %p770_p9 = scmp.lt.s32.totalorder %s768_s15, %s762_s9 }
 0x178   : > { %p765_p4 = pneg %p764_p11  ;;  %p771_p2 = por %p770_p9, %p769_p8 }
 0x17a   : > { %p772_p6 = pnand %p771_p2, %p765_p4 }
 0x17c   : > { %775 = shalt.err (!%p772_p6)
}
 0x17d   : > { %s776_s23 = scalar_lea.hbm %s1065_s7, %s1055_s18  ;;  %s780_s5 = scalar_lea.hbm %s1121_s3, 640 }
 0x17e   : > { %p777_p0 = scmp.ne.s32.totalorder %s1065_s7, %s776_s23  ;;  %p781_p10 = scmp.lt.u32.totalorder %s1065_s7, %s1121_s3 }
 0x17f   : > { %p782_p12 = scmp.lt.u32.totalorder %s780_s5, %s776_s23  ;;  %p784_p11 = scmp.lt.u32.totalorder %s776_s23, %s1065_s7 }
 0x180   : > { %p778_p7 = pnand %p777_p0, %p531_p13 }
 0x181   : > { %p783_p1 = por %p782_p12, %p781_p10 }
 0x182   : > { %p779_p5 = pneg %p778_p7 }
 0x183   : > { %p785_p4 = por %p784_p11, %p783_p1 }
 0x185   : > { %p786_p8 = pnand %p785_p4, %p779_p5 }
 0x187   : > { %789 = shalt.err (!%p786_p8)
}
 0x188   : > { %s857_s22 = smov 128   ;;  %s858_s21 = smov 8  }
 0x189   : > { %413 = dma.vmem_to_hbm [thread:$0]  (%p531_p13), %s1067_s26, %s1055_s18, %s1065_s7, %s387_s11, %s857_s22, %s857_s22, %s858_s21  }
 0x18a PF: > { %s422_s24 = sand.u32 1, %s828_s12   ;;  %p1138_p9 = scmp.ne.s32.totalorder %s1130_s28, 0 }
 0x18b   : > { %s423_s6 = scalar_lea.sflag [#allocation4], %s422_s24 }
 0x18c   : > { %p645_p2 = pnand %p519_p3, %p1138_p9 }
 0x18e   : > { %823 = dma.done.wait (!%p645_p2), %s423_s6, 384  }
 0x18f   : > { %825 = vsyncadd (!%p645_p2), %s423_s6, 4294966912  ;;  %s20_s17 = sadd.s32 1, %s848_s17   ;;  %s1139_s12 = smov %s832_s13 }
 0x190   : > { %p17_p6 = scmp.ge.s32.totalorder %s20_s17, 4   ;;  %s1140_s13 = smov %s836_s14 }
 0x191   : > { %s1141_s14 = smov %s941_s27  ;;  %s1142_s15 = smov %s844_s16 }
 0x192   : > { %s1143_s16 = smov %s1145_s20  ;;  %19 = sbr.rel (!%p17_p6) target bundleno = 7 (0x7), region = 85 }
 0x199   :  { %428 = vsyncpa [#allocation3], 1 }
 0x19a   :  { %430 = vsyncpa [#allocation3 + $0x1], 1 }
 0x19b   :  { %431 = vsyncpa [#allocation6], 1 }
 0x19c   :  { %432 = vsyncpa [#allocation4], 1 }
 0x19d   :  { %434 = vsyncpa [#allocation4 + $0x1], 1 }

</bundles_post_ra>
